<compile_context>
chip_gen: v7x
topology: tpu7x:2x2x1
jax: 0.10.0
libtpu: 0.0.40
codegen_flags: <defaults>
</compile_context>

<pallas_src>
import functools
import math

import numpy as np
import jax
import jax.numpy as jnp
from jax.experimental import pallas as pl
from jax.experimental.pallas import tpu as pltpu

BN_EPS = 1e-5
BN_SCALE = float(1.0 / np.sqrt(1.0 + BN_EPS))  # eval-mode BN with default stats


def _round_up(x, m):
    return (x + m - 1) // m * m


def _pick_tile(total, cap):
    """Largest multiple-of-128-stepped tile <= cap that divides `total`."""
    t = min(total, cap)
    while total % t:
        t -= 128
    return t


def _mish(x):
    # x * tanh(softplus(x)) with a single exp (exact rewrite):
    #   tanh(log1p(e^x)) = ((1 + e^x)^2 - 1) / ((1 + e^x)^2 + 1)
    t = jnp.exp(jnp.minimum(x, 20.0))
    u = (1.0 + t) * (1.0 + t)
    y = x * (u - 1.0) * pl.reciprocal(u + 1.0, approx=True)
    return jnp.where(x > 20.0, x, y)


# ---------------------------------------------------------------------------
# Pallas kernels
# ---------------------------------------------------------------------------
def _mm_kernel(act, has_res):
    """Tiled bf16 matmul, f32 accumulation, fused per-column affine (BN),
    optional fused residual add and Mish epilogue, bf16/f32 store."""

    def kern(*refs):
        if has_res:
            a_ref, b_ref, s_ref, t_ref, r_ref, o_ref, acc_ref = refs
        else:
            a_ref, b_ref, s_ref, t_ref, o_ref, acc_ref = refs
        k = pl.program_id(2)

        @pl.when(k == 0)
        def _():
            acc_ref[...] = jnp.zeros_like(acc_ref)

        acc_ref[...] += jnp.dot(a_ref[...], b_ref[...],
                                preferred_element_type=jnp.float32)

        @pl.when(k == pl.num_programs(2) - 1)
        def _():
            y = acc_ref[...] * s_ref[...] + t_ref[...]
            if has_res:
                y = y + r_ref[...].astype(jnp.float32)
            if act:
                y = _mish(y)
            o_ref[...] = y.astype(o_ref.dtype)

    return kern


def _matmul_affine(a, b, scale, shift, *, res=None, act=False,
                   out_dtype=jnp.bfloat16):
    """(M,K)@(K,N) in bf16 on the MXU, f32 accumulate, then per-column
    scale/shift (+ optional residual, + optional Mish), stored as out_dtype."""
    M, K = a.shape
    _, N = b.shape
    has_res = res is not None

    Mp = _round_up(M, 128)
    if Mp <= 512:
        BM = Mp
    else:
        BM = _pick_tile(Mp, 512)
        if BM < 256:                      # avoid tiny M tiles on big matrices
            Mp = _round_up(M, 512)
            BM = 512
    Np = _round_up(N, 128)
    BN = _pick_tile(Np, 512)              # collapses the N grid axis for N<=512
    Kp = _round_up(K, 128)

    # Collapse the K grid axis to a single step whenever the double-buffered
    # tiles fit a conservative budget (single weight DMA, no per-k overhead).
    def footprint(bk):
        a_b = BM * bk * 2
        b_b = bk * BN * 2
        o_b = BM * BN * 4
        r_b = BM * BN * 2 if has_res else 0
        return 2 * (a_b + b_b + o_b + r_b + 4 * BN * 4) + BM * BN * 4

    BK = Kp if footprint(Kp) <= (40 << 20) else _pick_tile(Kp, 1024)

    # v7x megacore: guarantee >=2 parallel grid steps when feasible.
    if Mp // BM < 2 and Np // BN < 2 and Mp >= 256:
        BM = _pick_tile(Mp, Mp // 2)

    vlim = int(min(max(footprint(BK) + (4 << 20), 32 << 20), 60 << 20))

    def pad2(x, rows, cols, dtype):
        x = x.astype(dtype)
        pr, pc = rows - x.shape[0], cols - x.shape[1]
        if pr or pc:
            x = jnp.pad(x, ((0, pr), (0, pc)))
        return x

    ap = pad2(a, Mp, Kp, jnp.bfloat16)
    bp = pad2(b, Kp, Np, jnp.bfloat16)
    sp = pad2(scale.reshape(1, N), 1, Np, jnp.float32)
    tp = pad2(shift.reshape(1, N), 1, Np, jnp.float32)

    a_spec = pl.BlockSpec((BM, BK), lambda i, j, k: (i, k))
    b_spec = pl.BlockSpec((BK, BN), lambda i, j, k: (k, j))
    v_spec = pl.BlockSpec((1, BN), lambda i, j, k: (0, j))
    o_spec = pl.BlockSpec((BM, BN), lambda i, j, k: (i, j))

    args = [ap, bp, sp, tp]
    in_specs = [a_spec, b_spec, v_spec, v_spec]
    if has_res:
        args.append(pad2(res, Mp, Np, jnp.bfloat16))
        in_specs.append(pl.BlockSpec((BM, BN), lambda i, j, k: (i, j)))

    out = pl.pallas_call(
        _mm_kernel(act, has_res),
        out_shape=jax.ShapeDtypeStruct((Mp, Np), out_dtype),
        grid_spec=pltpu.PrefetchScalarGridSpec(
            num_scalar_prefetch=0,
            grid=(Mp // BM, Np // BN, Kp // BK),
            in_specs=in_specs,
            out_specs=o_spec,
            scratch_shapes=[pltpu.VMEM((BM, BN), jnp.float32)]),
        compiler_params=pltpu.CompilerParams(
            dimension_semantics=("parallel", "parallel", "arbitrary"),
            vmem_limit_bytes=vlim),
    )(*args)
    if Mp != M or Np != N:
        out = out[:M, :N]
    return out


def _softreg_up_kernel(c_ref, u_ref, d_ref, m_ref, o_ref):
    # c: (bm, Dq) quarter-disparity cost (bf16); u: (Dq, D) lerp matrix;
    # d: (1, D) disparity values; m: (1, D) additive mask (-1e30 on padding).
    x = jnp.dot(c_ref[...], u_ref[...], preferred_element_type=jnp.float32)
    x = x + m_ref[...]
    mx = jnp.max(x, axis=-1, keepdims=True)
    e = jnp.exp(x - mx)
    s = jnp.sum(e, axis=-1, keepdims=True)
    num = jnp.sum(e * d_ref[...], axis=-1, keepdims=True)
    o_ref[...] = num * pl.reciprocal(s, approx=True)


@functools.partial(jax.jit, static_argnames=("H", "W", "maxdisp"))
def _pred3_from_cost(cost_q, *, H, W, maxdisp):
    """cost_q: (B, Dq, Hq, Wq) f32 quarter-res cost volume ->
    pred3: (B, H, W) = sum_d softmax_d(upsample(cost)) * d  (align_corners)."""
    B, Dq, Hq, Wq = cost_q.shape
    c = jnp.transpose(cost_q, (0, 2, 3, 1))        # (B, Hq, Wq, Dq)
    c = upsample_linear(c, 1, H)
    c = upsample_linear(c, 2, W)                    # (B, H, W, Dq)
    c = c.astype(jnp.bfloat16)

    Dqp = _round_up(Dq, 128)
    Dp = _round_up(maxdisp, 128)
    U = np.zeros((Dqp, Dp), np.float32)
    if Dq == 1:
        U[0, :maxdisp] = 1.0
    else:
        pos = np.arange(maxdisp) * (Dq - 1) / (maxdisp - 1)
        lo = np.clip(np.floor(pos).astype(np.int32), 0, Dq - 2)
        wgt = pos - lo
        for d in range(maxdisp):
            U[lo[d], d] += 1.0 - wgt[d]
            U[lo[d] + 1, d] += wgt[d]
    dvec = np.zeros((1, Dp), np.float32)
    dvec[0, :maxdisp] = np.arange(maxdisp)
    mvec = np.full((1, Dp), -1e30, np.float32)
    mvec[0, :maxdisp] = 0.0

    M = B * H * W
    x = c.reshape(M, Dq)
    Mp = _round_up(M, 128)
    bm = _pick_tile(Mp, 512)
    if bm < 256 and Mp >= 1024:
        Mp = _round_up(M, 512)
        bm = 512
    xp = jnp.pad(x, ((0, Mp - M), (0, Dqp - Dq)))

    out = pl.pallas_call(
        _softreg_up_kernel,
        out_shape=jax.ShapeDtypeStruct((Mp, 1), jnp.float32),
        grid_spec=pltpu.PrefetchScalarGridSpec(
            num_scalar_prefetch=0, grid=(Mp // bm,),
            in_specs=[pl.BlockSpec((bm, Dqp), lambda i: (i, 0)),
                      pl.BlockSpec((Dqp, Dp), lambda i: (0, 0)),
                      pl.BlockSpec((1, Dp), lambda i: (0, 0)),
                      pl.BlockSpec((1, Dp), lambda i: (0, 0))],
            out_specs=pl.BlockSpec((bm, 1), lambda i: (i, 0))),
        compiler_params=pltpu.CompilerParams(
            dimension_semantics=("parallel",),
            vmem_limit_bytes=32 * 1024 * 1024),
    )(xp, jnp.asarray(U, jnp.bfloat16), jnp.asarray(dvec), jnp.asarray(mvec))
    return out[:M, 0].reshape(B, H, W)


def _gwc_kernel(l_ref, r_ref, g_ref, o_ref):
    """Group-wise correlation volume: left/right H-strip resident in VMEM,
    static disparity loop in-register, group mean via a small MXU matmul."""
    _, S, W, C = l_ref.shape
    D = o_ref.shape[1]
    G = o_ref.shape[-1]
    l = l_ref[0]                                    # (S, W, C)
    r = r_ref[0]
    g = g_ref[...]                                  # (C, G) group-mean matrix
    for d in range(D):
        if d >= W:
            o_ref[0, d, :, :, :] = jnp.zeros((S, W, G), o_ref.dtype)
            continue
        if d == 0:
            rs = r
        else:
            rs = jnp.concatenate(
                [jnp.zeros((S, d, C), r.dtype), r[:, :W - d, :]], axis=1)
        prod = (l * rs).reshape(S * W, C)
        gm = jnp.dot(prod, g, preferred_element_type=jnp.float32)
        o_ref[0, d, :, :, :] = gm.reshape(S, W, G).astype(o_ref.dtype)


@functools.partial(jax.jit, static_argnames=("maxdisp", "num_groups"))
def build_gwc_volume(left, right, *, maxdisp, num_groups):
    """left/right: (B, H, W, C) -> (B, D, H, W, G) group-wise correlation."""
    B, Hq, Wq, C = left.shape
    cpg = C // num_groups
    S = 8 if Hq % 8 == 0 else Hq
    gmat = (np.arange(C)[:, None] // cpg ==
            np.arange(num_groups)[None, :]).astype(np.float32) / cpg
    out = pl.pallas_call(
        _gwc_kernel,
        out_shape=jax.ShapeDtypeStruct((B, maxdisp, Hq, Wq, num_groups),
                                       jnp.bfloat16),
        grid_spec=pltpu.PrefetchScalarGridSpec(
            num_scalar_prefetch=0,
            grid=(B, Hq // S),
            in_specs=[pl.BlockSpec((1, S, Wq, C), lambda b, h: (b, h, 0, 0)),
                      pl.BlockSpec((1, S, Wq, C), lambda b, h: (b, h, 0, 0)),
                      pl.BlockSpec((C, num_groups), lambda b, h: (0, 0))],
            out_specs=pl.BlockSpec((1, maxdisp, S, Wq, num_groups),
                                   lambda b, h: (b, 0, h, 0, 0))),
        compiler_params=pltpu.CompilerParams(
            dimension_semantics=("parallel", "parallel"),
            vmem_limit_bytes=48 * 1024 * 1024),
    )(left.astype(jnp.bfloat16), right.astype(jnp.bfloat16),
      jnp.asarray(gmat, jnp.bfloat16))
    return out


# ---------------------------------------------------------------------------
# Convolution wrappers (im2col glue in one jit per layer, matmul in Pallas)
# ---------------------------------------------------------------------------
@functools.partial(jax.jit,
                   static_argnames=("stride", "pad", "dilation", "act",
                                    "out_dtype"))
def _conv2d(x, w, scale, shift, res, *, stride, pad, dilation, act,
            out_dtype=jnp.bfloat16):
    x = x.astype(jnp.bfloat16)
    B, H, W, Cin = x.shape
    kh, kw, _, Cout = w.shape
    xp = jnp.pad(x, ((0, 0), (pad, pad), (pad, pad), (0, 0)))
    Ho = (H + 2 * pad - dilation * (kh - 1) - 1) // stride + 1
    Wo = (W + 2 * pad - dilation * (kw - 1) - 1) // stride + 1
    cols = []
    for ky in range(kh):
        for kx in range(kw):
            y0, x0 = ky * dilation, kx * dilation
            cols.append(xp[:, y0:y0 + (Ho - 1) * stride + 1:stride,
                           x0:x0 + (Wo - 1) * stride + 1:stride, :])
    # TODO(synk): replace materialized im2col with an implicit tap-axis read.
    patches = jnp.stack(cols, axis=-2).reshape(B * Ho * Wo, kh * kw * Cin)
    res2 = None if res is None else res.reshape(B * Ho * Wo, Cout)
    out = _matmul_affine(patches, w.reshape(kh * kw * Cin, Cout),
                         scale, shift, res=res2, act=act, out_dtype=out_dtype)
    return out.reshape(B, Ho, Wo, Cout)


@functools.partial(jax.jit, static_argnames=("stride", "pad", "act", "out_dtype"))
def _conv3d(x, w, scale, shift, res, *, stride, pad, act,
            out_dtype=jnp.bfloat16):
    x = x.astype(jnp.bfloat16)
    B, D, H, W, Cin = x.shape
    kd, kh, kw, _, Cout = w.shape
    xp = jnp.pad(x, ((0, 0), (pad, pad), (pad, pad), (pad, pad), (0, 0)))
    Do = (D + 2 * pad - kd) // stride + 1
    Ho = (H + 2 * pad - kh) // stride + 1
    Wo = (W + 2 * pad - kw) // stride + 1
    cols = []
    for kz in range(kd):
        for ky in range(kh):
            for kx in range(kw):
                cols.append(xp[:, kz:kz + (Do - 1) * stride + 1:stride,
                               ky:ky + (Ho - 1) * stride + 1:stride,
                               kx:kx + (Wo - 1) * stride + 1:stride, :])
    # TODO(synk): implicit im2col via tap grid axis / manual DMA (biggest win).
    patches = jnp.stack(cols, axis=-2).reshape(
        B * Do * Ho * Wo, kd * kh * kw * Cin)
    res2 = None if res is None else res.reshape(B * Do * Ho * Wo, Cout)
    out = _matmul_affine(patches, w.reshape(kd * kh * kw * Cin, Cout),
                         scale, shift, res=res2, act=act, out_dtype=out_dtype)
    return out.reshape(B, Do, Ho, Wo, Cout)


# ConvTranspose3d(k=3, stride=2, padding=1, output_padding=1) via 8-phase
# sub-pixel decomposition, fused into a SINGLE matmul with a block-structured
# (8*Cin, 8*Cout) weight (zero blocks for inactive tap/phase pairs).
_DECONV_TAP_OFFSETS = [(dz, dy, dx) for dz in (0, 1) for dy in (0, 1)
                       for dx in (0, 1)]


def _phase_tap_kernel(pbit, dbit):
    # kernel index for this (phase bit, input-offset bit) or None if inactive
    if pbit == 0:
        return 1 if dbit == 0 else None
    return 2 if dbit == 0 else 0


def _shift_left(x, axis):
    sl = [slice(None)] * x.ndim
    sl[axis] = slice(1, None)
    pad = [(0, 0)] * x.ndim
    pad[axis] = (0, 1)
    return jnp.pad(x[tuple(sl)], pad)


@functools.partial(jax.jit, static_argnames=("act",))
def _deconv3d(x, w, scale, shift, res, *, act):
    """ConvTranspose3d(3, s=2, p=1, output_padding=1) + BatchNorm affine with
    optional fused residual add + Mish.  Weights laid out w[kz,ky,kx,cin,cout]
    (synthetic, randomly initialised)."""
    x = x.astype(jnp.bfloat16)
    B, D, H, W, Cin = x.shape
    Cout = w.shape[-1]

    # A: (M, 8*Cin) -- the 8 shifted input taps, tap index t = dz*4+dy*2+dx.
    taps = []
    for dz, dy, dx in _DECONV_TAP_OFFSETS:
        t = x
        if dz:
            t = _shift_left(t, 1)
        if dy:
            t = _shift_left(t, 2)
        if dx:
            t = _shift_left(t, 3)
        taps.append(t)
    a = jnp.stack(taps, axis=-2).reshape(B * D * H * W, 8 * Cin)

    # B: (8*Cin, 8*Cout), block (tap, phase) = w[kz,ky,kx] where active.
    wb = jnp.zeros((8, Cin, 8, Cout), w.dtype)
    for ti, (dz, dy, dx) in enumerate(_DECONV_TAP_OFFSETS):
        for pi in range(8):
            pz, py, px = (pi >> 2) & 1, (pi >> 1) & 1, pi & 1
            kz = _phase_tap_kernel(pz, dz)
            ky = _phase_tap_kernel(py, dy)
            kx = _phase_tap_kernel(px, dx)
            if kz is None or ky is None or kx is None:
                continue
            wb = wb.at[ti, :, pi, :].set(w[kz, ky, kx])
    bm = wb.reshape(8 * Cin, 8 * Cout)

    scale8 = jnp.tile(scale, 8)
    shift8 = jnp.tile(shift, 8)
    rp = None
    if res is not None:
        r = res.reshape(B, D, 2, H, 2, W, 2, Cout)
        r = jnp.transpose(r, (0, 1, 3, 5, 2, 4, 6, 7))  # B,D,H,W,pz,py,px,C
        rp = r.reshape(B * D * H * W, 8 * Cout)

    y = _matmul_affine(a, bm, scale8, shift8, res=rp, act=act,
                       out_dtype=jnp.bfloat16)
    y = y.reshape(B, D, H, W, 2, 2, 2, Cout)
    y = jnp.transpose(y, (0, 1, 4, 2, 5, 3, 6, 7))
    return y.reshape(B, 2 * D, 2 * H, 2 * W, Cout)


# ---------------------------------------------------------------------------
# Parameters
# ---------------------------------------------------------------------------
class ParamStore:
    """Deterministic, name-keyed parameter creation (shared left/right)."""

    def __init__(self, seed=0):
        self._key = jax.random.PRNGKey(seed)
        self._store = {}
        self._count = 0

    def _get(self, name, shape, std):
        if name not in self._store:
            k = jax.random.fold_in(self._key, self._count)
            self._count += 1
            self._store[name] = std * jax.random.normal(k, shape, jnp.float32)
        return self._store[name]

    def conv2d(self, name, k, cin, cout):
        return self._get(name, (k, k, cin, cout), math.sqrt(2.0 / (k * k * cout)))

    def conv3d(self, name, k, cin, cout):
        return self._get(name, (k, k, k, cin, cout),
                         math.sqrt(2.0 / (k * k * k * cout)))


def _bn_scale(c):
    return jnp.full((c,), BN_SCALE, jnp.float32)


def _zeros(c):
    return jnp.zeros((c,), jnp.float32)


def _ones(c):
    return jnp.ones((c,), jnp.float32)


def convbn2d(P, name, x, cout, k, stride, pad, dilation, act, res=None):
    eff_pad = dilation if dilation > 1 else pad
    w = P.conv2d(name, k, x.shape[-1], cout)
    return _conv2d(x, w, _bn_scale(cout), _zeros(cout), res,
                   stride=stride, pad=eff_pad, dilation=dilation, act=act)


def conv2d_plain(P, name, x, cout, k, stride, pad, out_dtype=jnp.bfloat16):
    w = P.conv2d(name, k, x.shape[-1], cout)
    return _conv2d(x, w, _ones(cout), _zeros(cout), None,
                   stride=stride, pad=pad, dilation=1, act=False,
                   out_dtype=out_dtype)


def convbn3d(P, name, x, cout, k, stride, pad, act, res=None):
    w = P.conv3d(name, k, x.shape[-1], cout)
    return _conv3d(x, w, _bn_scale(cout), _zeros(cout), res,
                   stride=stride, pad=pad, act=act)


def conv3d_plain(P, name, x, cout, k, stride, pad, out_dtype=jnp.bfloat16):
    w = P.conv3d(name, k, x.shape[-1], cout)
    return _conv3d(x, w, _ones(cout), _zeros(cout), None,
                   stride=stride, pad=pad, act=False, out_dtype=out_dtype)


def deconv3d_bn(P, name, x, cout, res=None, act=False):
    w = P.conv3d(name, 3, x.shape[-1], cout)
    return _deconv3d(x, w, _bn_scale(cout), _zeros(cout), res, act=act)


# ---------------------------------------------------------------------------
# Network building blocks
# ---------------------------------------------------------------------------
def basic_block2d(P, name, x, planes, stride, pad, dilation, downsample):
    out = convbn2d(P, name + ".c1", x, planes, 3, stride, pad, dilation, True)
    if downsample:
        w = P.conv2d(name + ".ds", 1, x.shape[-1], planes)
        sc = _conv2d(x, w, _bn_scale(planes), _zeros(planes), None,
                     stride=stride, pad=0, dilation=1, act=False)
    else:
        sc = x
    # residual add fused into the second conv's epilogue
    return convbn2d(P, name + ".c2", out, planes, 3, 1, pad, dilation, False,
                    res=sc)


def make_layer2d(P, name, x, planes, blocks, stride, pad, dilation):
    inplanes = x.shape[-1]
    downsample = (stride != 1) or (inplanes != planes)
    x = basic_block2d(P, name + ".0", x, planes, stride, pad, dilation, downsample)
    for i in range(1, blocks):
        x = basic_block2d(P, name + ".%d" % i, x, planes, 1, pad, dilation, False)
    return x


def feature_extraction_fwd(P, x):
    x = convbn2d(P, "fe.f0", x, 32, 3, 2, 1, 1, True)
    x = convbn2d(P, "fe.f1", x, 32, 3, 1, 1, 1, True)
    x = convbn2d(P, "fe.f2", x, 32, 3, 1, 1, 1, True)
    x = make_layer2d(P, "fe.l1", x, 32, 3, 1, 1, 1)
    l2 = make_layer2d(P, "fe.l2", x, 64, 16, 2, 1, 1)
    l3 = make_layer2d(P, "fe.l3", l2, 128, 3, 1, 1, 1)
    l4 = make_layer2d(P, "fe.l4", l3, 128, 3, 1, 1, 2)
    l5 = make_layer2d(P, "fe.l5", l4, 192, 3, 2, 1, 1)
    l6 = make_layer2d(P, "fe.l7", l5, 256, 3, 2, 1, 1)
    l7 = make_layer2d(P, "fe.l9", l6, 512, 3, 2, 1, 1)
    fc = jnp.concatenate([l2, l3, l4], axis=-1)  # 320 channels

    def gw_head(nm, inp):
        h = convbn2d(P, nm + ".0", inp, 320, 3, 1, 1, 1, True)
        return conv2d_plain(P, nm + ".1", h, 320, 1, 1, 0)

    def concat_head(nm, inp):
        h = convbn2d(P, nm + ".0", inp, 128, 3, 1, 1, 1, True)
        return conv2d_plain(P, nm + ".1", h, 12, 1, 1, 0)

    gw1 = gw_head("fe.layer11", fc)
    gw2 = gw_head("fe.gw2", l5)
    gw3 = gw_head("fe.gw3", l6)
    gw4 = gw_head("fe.gw4", l7)
    refine = convbn2d(P, "fe.ref0", fc, 128, 3, 1, 1, 1, True)
    refine = convbn2d(P, "fe.ref1", refine, 32, 1, 1, 0, 1, True)
    return {
        "gw1": gw1, "gw2": gw2, "gw3": gw3, "gw4": gw4,
        "finetune_feature": refine,
        "concat_feature1": concat_head("fe.lastconv", fc),
        "concat_feature2": concat_head("fe.concat2", l5),
        "concat_feature3": concat_head("fe.concat3", l6),
        "concat_feature4": concat_head("fe.concat4", l7),
    }


def hourglass_fwd(P, name, x):
    c = x.shape[-1]
    conv1 = convbn3d(P, name + ".c1", x, 2 * c, 3, 2, 1, True)
    conv2 = convbn3d(P, name + ".c2", conv1, 2 * c, 3, 1, 1, True)
    conv3 = convbn3d(P, name + ".c3", conv2, 4 * c, 3, 2, 1, True)
    conv4 = convbn3d(P, name + ".c4", conv3, 4 * c, 3, 1, 1, True)
    redir2 = convbn3d(P, name + ".r2", conv2, 2 * c, 1, 1, 0, False)
    conv5 = deconv3d_bn(P, name + ".c5", conv4, 2 * c, res=redir2, act=True)
    redir1 = convbn3d(P, name + ".r1", x, c, 1, 1, 0, False)
    conv6 = deconv3d_bn(P, name + ".c6", conv5, c, res=redir1, act=True)
    return conv6


def hourglassup_fwd(P, name, x, f4, f5, f6):
    c = x.shape[-1]
    conv1 = conv3d_plain(P, name + ".c1", x, 2 * c, 3, 2, 1)
    conv1 = jnp.concatenate([conv1, f4], axis=-1)
    conv1 = convbn3d(P, name + ".comb1", conv1, 2 * c, 3, 1, 1, True)
    conv2 = convbn3d(P, name + ".c2", conv1, 2 * c, 3, 1, 1, True)
    conv3 = conv3d_plain(P, name + ".c3", conv2, 4 * c, 3, 2, 1)
    conv3 = jnp.concatenate([conv3, f5], axis=-1)
    conv3 = convbn3d(P, name + ".comb2", conv3, 4 * c, 3, 1, 1, True)
    conv4 = convbn3d(P, name + ".c4", conv3, 4 * c, 3, 1, 1, True)
    conv5 = conv3d_plain(P, name + ".c5", conv4, 4 * c, 3, 2, 1)
    conv5 = jnp.concatenate([conv5, f6], axis=-1)
    conv5 = convbn3d(P, name + ".comb3", conv5, 4 * c, 3, 1, 1, True)
    conv6 = convbn3d(P, name + ".c6", conv5, 4 * c, 3, 1, 1, True)
    redir3 = convbn3d(P, name + ".r3", conv4, 4 * c, 1, 1, 0, False)
    conv7 = deconv3d_bn(P, name + ".c7", conv6, 4 * c, res=redir3, act=True)
    redir2 = convbn3d(P, name + ".r2", conv2, 2 * c, 1, 1, 0, False)
    conv8 = deconv3d_bn(P, name + ".c8", conv7, 2 * c, res=redir2, act=True)
    redir1 = convbn3d(P, name + ".r1", x, c, 1, 1, 0, False)
    conv9 = deconv3d_bn(P, name + ".c9", conv8, c, res=redir1, act=True)
    return conv9


def refinenet3_fwd(P, name, x, disp):
    c1 = convbn2d(P, name + ".c1", x, 128, 3, 1, 1, 1, True)
    c2 = convbn2d(P, name + ".c2", c1, 128, 3, 1, 1, 1, True)
    c3 = convbn2d(P, name + ".c3", c2, 128, 3, 1, 2, 2, True)
    c4 = convbn2d(P, name + ".c4", c3, 128, 3, 1, 4, 4, True)
    c5 = make_layer2d(P, name + ".c5", c4, 96, 1, 1, 1, 8)
    c6 = make_layer2d(P, name + ".c6", c5, 64, 1, 1, 1, 16)
    c7 = make_layer2d(P, name + ".c7", c6, 32, 1, 1, 1, 1)
    c8 = conv2d_plain(P, name + ".c8", c7, 1, 3, 1, 1, out_dtype=jnp.float32)
    return disp + c8


# ---------------------------------------------------------------------------
# Cost volumes, warping, upsampling
# ---------------------------------------------------------------------------
def _shift_right_feature(right, d):
    # r[..., w, :] = right[..., w-d, :] (zero where w-d is out of range)
    B, H, W, C = right.shape
    if d == 0:
        return right
    if d > 0:
        return jnp.pad(right, ((0, 0), (0, 0), (d, 0), (0, 0)))[:, :, :W, :]
    return jnp.pad(right, ((0, 0), (0, 0), (0, -d), (0, 0)))[:, :, -d:, :]


@functools.partial(jax.jit, static_argnames=("maxdisp",))
def build_concat_volume(left, right, *, maxdisp):
    B, H, W, C = left.shape
    left = left.astype(jnp.bfloat16)
    right = right.astype(jnp.bfloat16)
    wid = jnp.arange(W)
    slices = []
    zero = jnp.zeros((), jnp.bfloat16)
    for d in range(maxdisp):
        if d == 0:
            l, r = left, right
        else:
            l = jnp.where((wid >= d)[None, None, :, None], left, zero)
            r = _shift_right_feature(right, d)
        slices.append(jnp.concatenate([l, r], axis=-1))
    return jnp.stack(slices, axis=1)  # (B, D, H, W, 2C)


@functools.partial(jax.jit, static_argnames=("maxdisp",))
def build_correlation_volume_dlast(left, right, *, maxdisp):
    # mean-over-channel correlation, disparity-last: (B, H, W, 2*maxdisp+1)
    outs = [jnp.mean(left * _shift_right_feature(right, d), axis=-1)
            for d in range(-maxdisp, maxdisp + 1)]
    return jnp.stack(outs, axis=-1)


@jax.jit
def warp(x, disp):
    # x: (B,H,W,C), disp: (B,H,W); bilinear x-warp, zeros padding + mask.
    # TODO(synk): replace take_along_axis gather with a one-hot MXU matmul
    # Pallas kernel (no fast hardware gather on TPU).
    B, H, W, C = x.shape
    xs = jnp.arange(W, dtype=jnp.float32)[None, None, :] - disp
    x0 = jnp.floor(xs)
    frac = xs - x0
    x0i = x0.astype(jnp.int32)
    x1i = x0i + 1
    v0 = ((x0i >= 0) & (x0i <= W - 1)).astype(jnp.float32)
    v1 = ((x1i >= 0) & (x1i <= W - 1)).astype(jnp.float32)
    x0c = jnp.clip(x0i, 0, W - 1)
    x1c = jnp.clip(x1i, 0, W - 1)
    idx0 = jnp.broadcast_to(x0c[..., None], (B, H, W, C))
    idx1 = jnp.broadcast_to(x1c[..., None], (B, H, W, C))
    g0 = jnp.take_along_axis(x, idx0, axis=2)
    g1 = jnp.take_along_axis(x, idx1, axis=2)
    w1 = frac
    w0 = 1.0 - frac
    out = (w0 * v0)[..., None] * g0 + (w1 * v1)[..., None] * g1
    mask = w0 * v0 + w1 * v1
    mask = jnp.where(mask < 0.999, 0.0, 1.0)
    return out * mask[..., None]


def upsample_linear(x, axis, out_size):
    # 1-D linear interpolation along `axis` with align_corners=True.
    n = x.shape[axis]
    if out_size == n:
        return x
    if n == 1:
        reps = [1] * x.ndim
        reps[axis] = out_size
        return jnp.tile(x, reps)
    pos = jnp.arange(out_size, dtype=jnp.float32) * (n - 1) / (out_size - 1)
    lo = jnp.clip(jnp.floor(pos).astype(jnp.int32), 0, n - 2)
    hi = lo + 1
    w = pos - lo.astype(jnp.float32)
    xlo = jnp.take(x, lo, axis=axis)
    xhi = jnp.take(x, hi, axis=axis)
    shape = [1] * x.ndim
    shape[axis] = out_size
    w = w.reshape(shape)
    return xlo * (1.0 - w) + xhi * w


# ---------------------------------------------------------------------------
# PCWNet forward (inference branch)
# ---------------------------------------------------------------------------
def pcwnet_forward(P, left_nchw, right_nchw, maxdisp):
    num_groups = 40
    left = jnp.transpose(left_nchw, (0, 2, 3, 1)).astype(jnp.float32)
    right = jnp.transpose(right_nchw, (0, 2, 3, 1)).astype(jnp.float32)
    B, H, W, _ = left.shape

    fl = feature_extraction_fwd(P, left)
    fr = feature_extraction_fwd(P, right)

    gv1 = build_gwc_volume(fl["gw1"], fr["gw1"], maxdisp=maxdisp // 4,
                           num_groups=num_groups)
    gv2 = build_gwc_volume(fl["gw2"], fr["gw2"], maxdisp=maxdisp // 8,
                           num_groups=num_groups)
    gv3 = build_gwc_volume(fl["gw3"], fr["gw3"], maxdisp=maxdisp // 16,
                           num_groups=num_groups)
    gv4 = build_gwc_volume(fl["gw4"], fr["gw4"], maxdisp=maxdisp // 32,
                           num_groups=num_groups)
    cv1 = build_concat_volume(fl["concat_feature1"], fr["concat_feature1"],
                              maxdisp=maxdisp // 4)
    cv2 = build_concat_volume(fl["concat_feature2"], fr["concat_feature2"],
                              maxdisp=maxdisp // 8)
    cv3 = build_concat_volume(fl["concat_feature3"], fr["concat_feature3"],
                              maxdisp=maxdisp // 16)
    cv4 = build_concat_volume(fl["concat_feature4"], fr["concat_feature4"],
                              maxdisp=maxdisp // 32)
    vol1 = jnp.concatenate([gv1, cv1], axis=-1)  # (B, D/4, H/4, W/4, 64)
    vol2 = jnp.concatenate([gv2, cv2], axis=-1)
    vol3 = jnp.concatenate([gv3, cv3], axis=-1)
    vol4 = jnp.concatenate([gv4, cv4], axis=-1)

    cost0 = convbn3d(P, "dres0.0", vol1, 32, 3, 1, 1, True)
    cost0 = convbn3d(P, "dres0.1", cost0, 32, 3, 1, 1, True)
    c = convbn3d(P, "dres1.0", cost0, 32, 3, 1, 1, True)
    cost0 = convbn3d(P, "dres1.1", c, 32, 3, 1, 1, False, res=cost0)

    combine = hourglassup_fwd(P, "comb1", cost0, vol2, vol3, vol4)
    out1 = hourglass_fwd(P, "dres2", combine)
    out2 = hourglass_fwd(P, "dres3", out1)
    out3 = hourglass_fwd(P, "dres4", out2)

    # --- inference branch ---
    cost3 = convbn3d(P, "cls3.0", out3, 32, 3, 1, 1, True)
    cost3 = conv3d_plain(P, "cls3.1", cost3, 1, 3, 1, 1,
                         out_dtype=jnp.float32)[..., 0]  # (B, D/4, H/4, W/4)
    # Spatial (H,W) trilinear upsample at quarter-disparity width (bf16); the
    # D-axis lerp + softmax + regression are fused in one Pallas kernel.
    pred3 = _pred3_from_cost(cost3, H=H, W=W, maxdisp=maxdisp)   # (B, H, W)

    rfl = fl["finetune_feature"].astype(jnp.float32)
    rfr = fr["finetune_feature"].astype(jnp.float32)
    rfl = upsample_linear(upsample_linear(rfl, 1, H), 2, W)       # bilinear
    rfr = upsample_linear(upsample_linear(rfr, 1, H), 2, W)
    rfr_warp = warp(rfr, pred3)

    costvol = build_correlation_volume_dlast(rfl, rfr_warp, maxdisp=24)  # 49ch

    pred3_c = pred3[..., None]                                    # (B,H,W,1)
    pred3feature = convbn2d(P, "dispup", pred3_c, 32, 1, 1, 0, 1, True)
    refinenet_combine = jnp.concatenate(
        [rfl - rfr_warp, rfl, pred3feature.astype(jnp.float32), pred3_c,
         costvol], axis=-1)                                       # 146 channels
    disp_finetune = refinenet3_fwd(P, "refinenet3", refinenet_combine, pred3_c)
    return disp_finetune[..., 0]  # (B, H, W)


# ---------------------------------------------------------------------------
if __name__ == "__main__":
    B, H, W = 1, 32, 32
    maxdisp = 32  # must be a multiple of 32 (network downsamples to /32)
    key = jax.random.PRNGKey(0)
    kl, kr = jax.random.split(key)
    left = jax.random.normal(kl, (B, 3, H, W), jnp.float32)
    right = jax.random.normal(kr, (B, 3, H, W), jnp.float32)

    P = ParamStore(seed=0)
    out = pcwnet_forward(P, left, right, maxdisp)
    out = jax.block_until_ready(out)
    assert out.shape == (B, H, W), out.shape
    print("KERNEL_OK")
</pallas_src>

<mosaic_0001>
module attributes {stable_mosaic.version = 11 : i64} {
  func.func @kern(%arg0: i32, %arg1: i32, %arg2: i32, %arg3: memref<128x128xbf16, #tpu.memory_space<vmem>>, %arg4: memref<128x128xbf16, #tpu.memory_space<vmem>>, %arg5: memref<1x128xf32, #tpu.memory_space<vmem>>, %arg6: memref<1x128xf32, #tpu.memory_space<vmem>>, %arg7: memref<128x128xbf16, #tpu.memory_space<vmem>>, %arg8: memref<128x128xf32, #tpu.memory_space<vmem>>) attributes {dimension_semantics = [#tpu.dimension_semantics<parallel>, #tpu.dimension_semantics<parallel>, #tpu.dimension_semantics<arbitrary>], iteration_bounds = array<i64: 2, 1, 1>, scalar_prefetch = 0 : i64, scratch_operands = 1 : i64, tpu.core_type = #tpu.core_type<tc>, window_params = [{transform_indices = @transform_0, window_bounds = array<i64: 128, 128>}, {transform_indices = @transform_1, window_bounds = array<i64: 128, 128>}, {transform_indices = @transform_2, window_bounds = array<i64: 1, 128>}, {transform_indices = @transform_3, window_bounds = array<i64: 1, 128>}, {transform_indices = @transform_4, window_bounds = array<i64: 128, 128>}]} {
    %c0_i32 = arith.constant 0 : i32
    %0 = arith.cmpi eq, %arg2, %c0_i32 : i32
    %1 = arith.extui %0 : i1 to i32
    %c0_i32_0 = arith.constant 0 : i32
    %2 = arith.cmpi ne, %1, %c0_i32_0 : i32
    scf.if %2 {
      %cst_10 = arith.constant 0.000000e+00 : f32
      %12 = vector.broadcast %cst_10 : f32 to vector<128x128xf32>
      %c0_11 = arith.constant 0 : index
      %c0_12 = arith.constant 0 : index
      %13 = vector.load %arg8[%c0_11, %c0_12] : memref<128x128xf32, #tpu.memory_space<vmem>>, vector<128x128xf32>
      tpu.vector_store %arg8[%c0_11, %c0_12], %12 {strides = array<i32>} : memref<128x128xf32, #tpu.memory_space<vmem>>, vector<128x128xf32>,
    } else {
    }
    %c0 = arith.constant 0 : index
    %c0_1 = arith.constant 0 : index
    %3 = vector.load %arg8[%c0, %c0_1] : memref<128x128xf32, #tpu.memory_space<vmem>>, vector<128x128xf32>
    %c0_2 = arith.constant 0 : index
    %c0_3 = arith.constant 0 : index
    %4 = vector.load %arg3[%c0_2, %c0_3] : memref<128x128xbf16, #tpu.memory_space<vmem>>, vector<128x128xbf16>
    %c0_4 = arith.constant 0 : index
    %c0_5 = arith.constant 0 : index
    %5 = vector.load %arg4[%c0_4, %c0_5] : memref<128x128xbf16, #tpu.memory_space<vmem>>, vector<128x128xbf16>
    %cst = arith.constant dense<0.000000e+00> : vector<128x128xf32>
    %6 = tpu.matmul %4, %5, %cst {dimension_numbers = #tpu.dot_dimension_numbers<[1], [0], [0], [1], [0, 0, 1, 1], [], []>} : vector<128x128xbf16>, vector<128x128xbf16>, vector<128x128xf32> -> vector<128x128xf32>
    %7 = arith.addf %3, %6 : vector<128x128xf32>
    %c0_6 = arith.constant 0 : index
    %c0_7 = arith.constant 0 : index
    %8 = vector.load %arg8[%c0_6, %c0_7] : memref<128x128xf32, #tpu.memory_space<vmem>>, vector<128x128xf32>
    tpu.vector_store %arg8[%c0_6, %c0_7], %7 {strides = array<i32>} : memref<128x128xf32, #tpu.memory_space<vmem>>, vector<128x128xf32>,
    %c0_i32_8 = arith.constant 0 : i32
    %9 = arith.cmpi eq, %arg2, %c0_i32_8 : i32
    %10 = arith.extui %9 : i1 to i32
    %c0_i32_9 = arith.constant 0 : i32
    %11 = arith.cmpi ne, %10, %c0_i32_9 : i32
    scf.if %11 {
      %c0_10 = arith.constant 0 : index
      %c0_11 = arith.constant 0 : index
      %12 = vector.load %arg8[%c0_10, %c0_11] : memref<128x128xf32, #tpu.memory_space<vmem>>, vector<128x128xf32>
      %c0_12 = arith.constant 0 : index
      %c0_13 = arith.constant 0 : index
      %13 = vector.load %arg5[%c0_12, %c0_13] : memref<1x128xf32, #tpu.memory_space<vmem>>, vector<1x128xf32>
      %14 = vector.broadcast %13 : vector<1x128xf32> to vector<128x128xf32>
      %15 = arith.mulf %12, %14 : vector<128x128xf32>
      %c0_14 = arith.constant 0 : index
      %c0_15 = arith.constant 0 : index
      %16 = vector.load %arg6[%c0_14, %c0_15] : memref<1x128xf32, #tpu.memory_space<vmem>>, vector<1x128xf32>
      %17 = vector.broadcast %16 : vector<1x128xf32> to vector<128x128xf32>
      %18 = arith.addf %15, %17 : vector<128x128xf32>
      %cst_16 = arith.constant 2.000000e+01 : f32
      %19 = vector.broadcast %cst_16 : f32 to vector<128x128xf32>
      %20 = arith.minimumf %18, %19 : vector<128x128xf32>
      %21 = math.exp %20 : vector<128x128xf32>
      %cst_17 = arith.constant 1.000000e+00 : f32
      %22 = vector.broadcast %cst_17 : f32 to vector<128x128xf32>
      %23 = arith.addf %22, %21 : vector<128x128xf32>
      %cst_18 = arith.constant 1.000000e+00 : f32
      %24 = vector.broadcast %cst_18 : f32 to vector<128x128xf32>
      %25 = arith.addf %24, %21 : vector<128x128xf32>
      %26 = arith.mulf %23, %25 : vector<128x128xf32>
      %cst_19 = arith.constant 1.000000e+00 : f32
      %27 = vector.broadcast %cst_19 : f32 to vector<128x128xf32>
      %28 = arith.subf %26, %27 : vector<128x128xf32>
      %29 = arith.mulf %18, %28 : vector<128x128xf32>
      %cst_20 = arith.constant 1.000000e+00 : f32
      %30 = vector.broadcast %cst_20 : f32 to vector<128x128xf32>
      %31 = arith.addf %26, %30 : vector<128x128xf32>
      %32 = tpu.reciprocal %31 {approx = true} : vector<128x128xf32> -> vector<128x128xf32>
      %33 = arith.mulf %29, %32 : vector<128x128xf32>
      %cst_21 = arith.constant 2.000000e+01 : f32
      %34 = vector.broadcast %cst_21 : f32 to vector<128x128xf32>
      %35 = arith.cmpf ogt, %18, %34 : vector<128x128xf32>
      %36 = arith.select %35, %18, %33 : vector<128x128xi1>, vector<128x128xf32>
      %37 = arith.truncf %36 : vector<128x128xf32> to vector<128x128xbf16>
      %c0_22 = arith.constant 0 : index
      %c0_23 = arith.constant 0 : index
      %38 = vector.load %arg7[%c0_22, %c0_23] : memref<128x128xbf16, #tpu.memory_space<vmem>>, vector<128x128xbf16>
      tpu.vector_store %arg7[%c0_22, %c0_23], %37 {strides = array<i32>} : memref<128x128xbf16, #tpu.memory_space<vmem>>, vector<128x128xbf16>,
    } else {
    }
    return
  }
  func.func @transform_0(%arg0: i32, %arg1: i32, %arg2: i32) -> (i32, i32) {
    %c0_i32 = arith.constant 0 : i32
    return %arg0, %arg2 : i32, i32
  }
  func.func @transform_1(%arg0: i32, %arg1: i32, %arg2: i32) -> (i32, i32) {
    %c0_i32 = arith.constant 0 : i32
    return %arg2, %arg1 : i32, i32
  }
  func.func @transform_2(%arg0: i32, %arg1: i32, %arg2: i32) -> (i32, i32) {
    %c0_i32 = arith.constant 0 : i32
    %c0_i32_0 = arith.constant 0 : i32
    return %c0_i32, %arg1 : i32, i32
  }
  func.func @transform_3(%arg0: i32, %arg1: i32, %arg2: i32) -> (i32, i32) {
    %c0_i32 = arith.constant 0 : i32
    %c0_i32_0 = arith.constant 0 : i32
    return %c0_i32, %arg1 : i32, i32
  }
  func.func @transform_4(%arg0: i32, %arg1: i32, %arg2: i32) -> (i32, i32) {
    %c0_i32 = arith.constant 0 : i32
    return %arg0, %arg1 : i32, i32
  }
}

</mosaic_0001>

<bundles_post_ra>
// kernel: _conv2d.1
= control target key start
LH: loop header
LB: loop body
LE: loop exit
PB: predicated region body
PF: predicated region fallthrough
CT: control target
= control target key end

     0   :  { %9 = vsyncpa [#allocation4], 0  ;;  %s1828_s0 = inlined_call_operand.vmem [shape: bf16[256,128], index: 0, kind: input, shape index: {}]   ;;  %s1829_s1 = inlined_call_operand.vmem [shape: bf16[128,128], index: 1, kind: input, shape index: {}]   ;;  %s1830_s2 = inlined_call_operand.vmem [shape: f32[1,128], index: 2, kind: input, shape index: {}]   ;;  %s1831_s3 = inlined_call_operand.vmem [shape: f32[1,128], index: 3, kind: input, shape index: {}]   ;;  %s1832_s4 = inlined_call_operand.hbm [shape: bf16[256,128], index: 4, kind: output, shape index: {}]  }
   0x1   :  { %11 = vsyncpa [#allocation4 + $0x1], 0  ;;  %s1497_s15 = smov 0   ;;  %s1499_s16 = smov 0  }
   0x2   :  { %s1501_s17 = smov 0   ;;  %s1503_s18 = smov 0  }
   0x3   :  { %s1505_s19 = smov 0   ;;  %s1507_s20 = smov 0  }
   0x4 LB: > { %s1058_s21 = sadd.s32 4294967295, %s1467_s20   ;;  %s1059_s22 = sadd.s32 4294967294, %s1467_s20   ;;  %s1467_s20 = sphi %s1507_s20, %s17_s20   ;;  %s1463_s19 = sphi %s1505_s19, %s1839_s19   ;;  %s1459_s18 = sphi %s1503_s18, %s1838_s18   ;;  %s1455_s17 = sphi %s1501_s17, %s1837_s17   ;;  %s1451_s16 = sphi %s1499_s16, %s1836_s16   ;;  %s1447_s15 = sphi %s1497_s15, %s1835_s15  }
   0x5   : > { %s36_s23 = sadd.s32 1, %s1463_s19  ;;  %s153_s24 = sadd.s32 1, %s1455_s17 }
   0x6   : > { %p38_p0 = scmp.ge.s32.totalorder %s36_s23, 2  ;;  %p163_p1 = scmp.ne.s32.totalorder %s1455_s17, %s1451_s16 }
   0x7   : > { %p164_p2 = scmp.eq.s32.totalorder %s1058_s21, 1  ;;  %p169_p3 = scmp.ne.s32.totalorder %s1451_s16, %s1447_s15 }
   0x8   : > { %s1841_s23 = smov (%p38_p0, %s36_s23), 0  ;;  %p170_p5 = scmp.eq.s32.totalorder %s1059_s22, 1 }
   0x9   : > { %p1537_p4 = por %p164_p2, %p163_p1  ;;  %s148_s26 = ssub.s32 %s1463_s19, %s1841_s23 }
   0xa   : > { %p1065_p6 = scmp.ge.s32.totalorder %s1467_s20, 1  ;;  %p151_p7 = scmp.eq.s32.totalorder %s148_s26, 0 }
   0xb   : > { %p1544_p8 = por %p170_p5, %p169_p3  ;;  %p224_p9 = scmp.lt.s32.totalorder %s1467_s20, 3 }
   0xc   : > { %s1550_s28 = scalar_select %p151_p7, %s1455_s17, %s153_s24  }
   0xd   : > { %p225_p10 = pnand %p1065_p6, %p224_p9 }
   0xe   : > { %v1309_v0 = vld [vmem:[%s1829_s1] sm:$0xff] (!%p225_p10)   ;;  %s1067_s5 = sshll.u32 (!%p225_p10), %s1459_s18, 4  ;;  %v1310_v1 = vld [vmem:[%s1829_s1 + $0x8] sm:$0xff] (!%p225_p10)   ;;  %v1311_v2 = vld [vmem:[%s1829_s1 + $0x10] sm:$0xff] (!%p225_p10)   ;;  %s264_s12 = sand.u32 (!%p225_p10), 1, %s1451_s16  }
   0xf   : > { %228 = sbr.rel (%p225_p10) target bundleno = 356 (0x164), region = 36  ;;  %p268_p11 = scmp.lt.s32.totalorder (!%p225_p10), %s1067_s5, 31  ;;  %1204 = vmatprep.subr.bf16.mxu0 (!%p225_p10), %v1309_v0  ;;  %1236 = vmatprep.subr.bf16.mxu1 (!%p225_p10), %v1309_v0  ;;  %v1312_v3 = vld [vmem:[%s1829_s1 + $0x18] sm:$0xff] (!%p225_p10)   ;;  %v1313_v6 = vld [vmem:[%s1829_s1 + $0x20] sm:$0xff] (!%p225_p10)   ;;  %v1314_v7 = vld [vmem:[%s1829_s1 + $0x28] sm:$0xff] (!%p225_p10)  }
  0x10   : > { %1205 = vmatpush3.bf16.msra.mxu0 (!%p225_p10), %v1309_v0  ;;  %1244 = vmatpush3.bf16.msra.mxu1 (!%p225_p10), %v1309_v0  ;;  %v1315_v8 = vld [vmem:[%s1829_s1 + $0x30] sm:$0xff] (!%p225_p10)   ;;  %v1316_v9 = vld [vmem:[%s1829_s1 + $0x38] sm:$0xff] (!%p225_p10)   ;;  %v1593_v16 = vld [vmem:[%s1830_s2] ss:$0 sm:$0xff] (!%p225_p10)  ;;  %s1140_s21 = sshll.u32 (!%p225_p10), %s1459_s18, 10  ;;  %s1782_s18 = scalar_lea.sflag (!%p225_p10), [#allocation4], %s264_s12 }
  0x11   : > { %1206 = vmatprep.subr.bf16.mxu0 (!%p225_p10), %v1310_v1  ;;  %1237 = vmatprep.subr.bf16.mxu1 (!%p225_p10), %v1310_v1  ;;  %v1598_v18 = vld [vmem:[%s1831_s3] ss:$0 sm:$0xff] (!%p225_p10)  ;;  %s1775_s29 = scalar_lea.hbm (!%p225_p10), %s1832_s4, %s1140_s21 }
  0x14   : > { %1207 = vmatpush3.bf16.msra.mxu0 (!%p225_p10), %v1310_v1  ;;  %1245 = vmatpush3.bf16.msra.mxu1 (!%p225_p10), %v1310_v1 }
  0x15   : > { %1208 = vmatprep.subr.bf16.mxu0 (!%p225_p10), %v1311_v2  ;;  %1238 = vmatprep.subr.bf16.mxu1 (!%p225_p10), %v1311_v2 }
  0x16   : > { %s1843_s5 = smov (!%p268_p11, %s1067_s5), 31 }
  0x17   : > { %s1068_s10 = sshll.u32 %s1843_s5, 2  ;;  %s1469_s5 = smov [#allocation3]  }
  0x18   : > { %s1565_s13 = scalar_lea.vmem %s1828_s0, %s1068_s10  ;;  %1209 = vmatpush3.bf16.msra.mxu0 %v1311_v2  ;;  %1246 = vmatpush3.bf16.msra.mxu1 %v1311_v2  ;;  %s1393_s6 = sshll.u32 %s1469_s5, 4  ;;  %s1394_s6 = int_to_ptr.vmem [resolvable:$false] %s1393_s6 }
  0x19   : > { %v1317_v4 = vld [vmem:[%s1565_s13] sm:$0xff]   ;;  %1210 = vmatprep.subr.bf16.mxu0 %v1312_v3  ;;  %1239 = vmatprep.subr.bf16.mxu1 %v1312_v3  ;;  %v1319_v10 = vld [vmem:[%s1565_s13 + $0x8] sm:$0xff]   ;;  %v1321_v12 = vld [vmem:[%s1565_s13 + $0x10] sm:$0xff]   ;;  %s1395_s7 = scalar_lea.vmem %s1394_s6, 2048 }
  0x1a   : > { %v1318_v5 = vld [vmem:[%s1565_s13 + $0x20] sm:$0xff]   ;;  %1220 = vmatprep.mubr.bf16.mxu0 %v1317_v4  ;;  %v1320_v11 = vld [vmem:[%s1565_s13 + $0x28] sm:$0xff]   ;;  %v1322_v13 = vld [vmem:[%s1565_s13 + $0x30] sm:$0xff]  }
  0x1b   : > { %1228 = vmatprep.mubr.bf16.mxu1 %v1318_v5  ;;  %v1323_v14 = vld [vmem:[%s1565_s13 + $0x18] sm:$0xff]  }
  0x1c   : > { %1211 = vmatpush3.bf16.msra.mxu0 %v1312_v3  ;;  %1247 = vmatpush3.bf16.msra.mxu1 %v1312_v3  ;;  %v1324_v15 = vld [vmem:[%s1565_s13 + $0x38] sm:$0xff]   ;;  %s1066_s13 = sshll.u32 %s264_s12, 6 }
  0x1d   : > { %1212 = vmatprep.subr.bf16.mxu0 %v1313_v6  ;;  %1240 = vmatprep.subr.bf16.mxu1 %v1313_v6  ;;  %s1721_s14 = scalar_lea.vmem [#allocation3], %s1066_s13 }
  0x1e   : > { %s938_s22 = sshll.u32 %s1721_s14, 4  ;;  %s1777_s22 = int_to_ptr.vmem [resolvable:$true] %s938_s22 }
  0x1f   : > { %s1389_s30 = scalar_lea.vmem %s1777_s22, 1024  ;;  %p1396_p1 = scmp.lt.s32.totalorder %s1777_s22, %s1394_s6 }
  0x20   : > { %1213 = vmatpush3.bf16.msra.mxu0 %v1313_v6  ;;  %1248 = vmatpush3.bf16.msra.mxu1 %v1313_v6  ;;  %p1390_p12 = scmp.ne.s32.totalorder %s1777_s22, %s1389_s30  ;;  %p1397_p2 = scmp.lt.s32.totalorder %s1395_s7, %s1389_s30 }
  0x21   : > { %1214 = vmatprep.subr.bf16.mxu0 %v1314_v7  ;;  %1241 = vmatprep.subr.bf16.mxu1 %v1314_v7 }
  0x22   : > { %p1391_p13 = pnand %p1390_p12, %p1537_p4  ;;  %p1398_p3 = por %p1397_p2, %p1396_p1 }
  0x24   : > { %1215 = vmatpush3.bf16.msra.mxu0 %v1314_v7  ;;  %1249 = vmatpush3.bf16.msra.mxu1 %v1314_v7  ;;  %p1392_p0 = pneg %p1391_p13 }
  0x25   : > { %1216 = vmatprep.subr.bf16.mxu0 %v1315_v8  ;;  %1242 = vmatprep.subr.bf16.mxu1 %v1315_v8 }
  0x26   : > { %p1399_p5 = pnand %p1398_p3, %p1392_p0 }
  0x28   : > { %1217 = vmatpush3.bf16.msra.mxu0 %v1315_v8  ;;  %1250 = vmatpush3.bf16.msra.mxu1 %v1315_v8 }
  0x29   : > { %1218 = vmatprep.subr.bf16.mxu0 %v1316_v9  ;;  %1243 = vmatprep.subr.bf16.mxu1 %v1316_v9 }
  0x2c   : > { %1219 = vmatpush3.bf16.msra.mxu0 %v1316_v9  ;;  %1251 = vmatpush3.bf16.msra.mxu1 %v1316_v9 }
  0x2f   : > { %1221 = vmatmul.mubr.bf16.vlgmr.msra.gmra.mrb[0].mxu0 %v1319_v10  ;;  %1229 = vmatmul.mubr.bf16.vlgmr.msra.gmra.mrb[0].mxu1 %v1320_v11 }
  0x30   : > { %1224 = vmatprep.mubr.bf16.mxu0 %v1321_v12  ;;  %1232 = vmatprep.mubr.bf16.mxu1 %v1322_v13 }
  0x37   : > { %1225 = vmatmul.mubr.bf16.gmra.mrb[4].mxu0 %v1323_v14  ;;  %1233 = vmatmul.mubr.bf16.gmra.mrb[4].mxu1 %v1324_v15 }
 0x102   : > { %v1222_v17 = vpop.f32.mrb[0].mxu0  ;;  %v1230_v19 = vpop.f32.mrb[0].mxu1 }
 0x103   : > { %v614_v20 = vmul.f32 %v1222_v17, %v1593_v16  ;;  %v622_v21 = vmul.f32 %v1230_v19, %v1593_v16  ;;  %v491_v22 = vpop.f32.mrb[1].mxu0  ;;  %v523_v23 = vpop.f32.mrb[1].mxu1 }
 0x104   : > { %v612_v24 = vmul.f32 %v1593_v16, %v491_v22  ;;  %v620_v25 = vmul.f32 %v1593_v16, %v523_v23  ;;  %v1223_v26 = vpop.f32.mrb[2].mxu0  ;;  %v1231_v27 = vpop.f32.mrb[2].mxu1 }
 0x105   : > { %v1605_v28 = vadd.f32 %v1598_v18, %v614_v20  ;;  %v1608_v29 = vadd.f32 %v1598_v18, %v622_v21  ;;  %v615_v30 = vmul.f32 %v1223_v26, %v1593_v16  ;;  %v623_v31 = vmul.f32 %v1231_v27, %v1593_v16  ;;  %v494_v32 = vpop.f32.mrb[3].mxu0  ;;  %v526_v33 = vpop.f32.mrb[3].mxu1 }
 0x106   : > { %v1613_v34 = vadd.f32 %v1598_v18, %v612_v24  ;;  %v1616_v35 = vadd.f32 %v1598_v18, %v620_v25  ;;  %v613_v36 = vmul.f32 %v1593_v16, %v494_v32  ;;  %v621_v37 = vmul.f32 %v1593_v16, %v526_v33 }
 0x107   : > { %v653_v38 = vmin.f32 %v1605_v28, 20.0  ;;  %v661_v39 = vmin.f32 %v1608_v29, 20.0  ;;  %v1625_v44 = vadd.f32 %v1598_v18, %v615_v30  ;;  %v1628_v45 = vadd.f32 %v1598_v18, %v623_v31 }
 0x108   : > { %v651_v40 = vmin.f32 %v1613_v34, 20.0  ;;  %v659_v41 = vmin.f32 %v1616_v35, 20.0  ;;  %v1631_v48 = vadd.f32 %v1598_v18, %v613_v36  ;;  %v1634_v49 = vadd.f32 %v1598_v18, %v621_v37 }
 0x109   : > { %v671_v42 = vmul.f32 1.442695, %v653_v38  ;;  %v687_v43 = vmul.f32 1.442695, %v661_v39  ;;  %v654_v52 = vmin.f32 %v1625_v44, 20.0  ;;  %v662_v53 = vmin.f32 %v1628_v45, 20.0 }
 0x10a   : > { %v667_v46 = vmul.f32 1.442695, %v651_v40  ;;  %v683_v47 = vmul.f32 1.442695, %v659_v41  ;;  %v1226_v50 = vpop.f32.mrb[4].mxu0  ;;  %v1234_v51 = vpop.f32.mrb[4].mxu1 }
 0x10b   : > { %1325 = vpow2.f32 %v671_v42  ;;  %v507_v54 = vpop.f32.mrb[5].mxu0  ;;  %v539_v55 = vpop.f32.mrb[5].mxu1  ;;  %v652_v56 = vmin.f32 %v1631_v48, 20.0  ;;  %v673_v59 = vmul.f32 1.442695, %v654_v52  ;;  %v660_v61 = vmin.f32 %v1634_v49, 20.0 }
 0x10c   : > { %1327 = vpow2.f32 %v687_v43  ;;  %v1227_v57 = vpop.f32.mrb[6].mxu0  ;;  %v1235_v58 = vpop.f32.mrb[6].mxu1  ;;  %v689_v60 = vmul.f32 1.442695, %v662_v53  ;;  %v618_v0 = vmul.f32 %v1226_v50, %v1593_v16  ;;  %v626_v3 = vmul.f32 %v1234_v51, %v1593_v16 }
 0x10d   : > { %1329 = vpow2.f32 %v667_v46  ;;  %v1640_v62 = vpop.f32.mrb[7].mxu0  ;;  %v669_v63 = vmul.f32 1.442695, %v652_v56  ;;  %v1643_v1 = vpop.f32.mrb[7].mxu1  ;;  %v685_v2 = vmul.f32 1.442695, %v660_v61  ;;  %v619_v6 = vmul.f32 %v1227_v57, %v1593_v16 }
 0x10e   : > { %1331 = vpow2.f32 %v683_v47  ;;  %v1647_v4 = vadd.f32 %v1598_v18, %v618_v0  ;;  %v1650_v5 = vadd.f32 %v1598_v18, %v626_v3  ;;  %v616_v11 = vmul.f32 %v1593_v16, %v507_v54 }
 0x10f   : > { %1333 = vpow2.f32 %v673_v59  ;;  %v1657_v12 = vadd.f32 %v1598_v18, %v619_v6  ;;  %v624_v23 = vmul.f32 %v1593_v16, %v539_v55  ;;  %v627_v37 = vmul.f32 %v1235_v58, %v1593_v16 }
 0x110   : > { %1335 = vpow2.f32 %v689_v60  ;;  %v657_v7 = vmin.f32 %v1647_v4, 20.0  ;;  %v665_v8 = vmin.f32 %v1650_v5, 20.0  ;;  %v1661_v27 = vadd.f32 %v1598_v18, %v616_v11 }
 0x111   : > { %1337 = vpow2.f32 %v669_v63  ;;  %v658_v30 = vmin.f32 %v1657_v12, 20.0  ;;  %v1666_v46 = vadd.f32 %v1598_v18, %v624_v23  ;;  %v1670_v56 = vadd.f32 %v1598_v18, %v627_v37 }
 0x112   : > { %1339 = vpow2.f32 %v685_v2  ;;  %v679_v9 = vmul.f32 1.442695, %v657_v7  ;;  %v695_v19 = vmul.f32 1.442695, %v665_v8  ;;  %v655_v53 = vmin.f32 %v1661_v27, 20.0 }
 0x113   : > { %v681_v50 = vmul.f32 1.442695, %v658_v30  ;;  %v663_v60 = vmin.f32 %v1666_v46, 20.0  ;;  %v666_v3 = vmin.f32 %v1670_v56, 20.0  ;;  %vm813_vm0 = vcmp.gt.f32.partialorder %v1605_v28, 20.0 }
 0x114   : > { %1341 = vpow2.f32 %v679_v9  ;;  %v675_v7 = vmul.f32 1.442695, %v655_v53  ;;  %vm821_vm1 = vcmp.gt.f32.partialorder %v1608_v29, 20.0  ;;  %vm814_vm2 = vcmp.gt.f32.partialorder %v1625_v44, 20.0 }
 0x115   : > { %v1326_v10 = vpop.eup %1325  ;;  %1343 = vpow2.f32 %v695_v19  ;;  %v691_v11 = vmul.f32 1.442695, %v663_v60  ;;  %vm822_vm3 = vcmp.gt.f32.partialorder %v1628_v45, 20.0  ;;  %vm811_vm4 = vcmp.gt.f32.partialorder %v1613_v34, 20.0 }
 0x116   : > { %v1328_v13 = vpop.eup %1327  ;;  %v701_v14 = vadd.f32 1.0, %v1326_v10  ;;  %vm812_vm5 = vcmp.gt.f32.partialorder %v1631_v48, 20.0  ;;  %vm819_vm6 = vcmp.gt.f32.partialorder %v1616_v35, 20.0  ;;  %vm820_vm7 = vcmp.gt.f32.partialorder %v1634_v49, 20.0 }
 0x117   : > { %v1330_v15 = vpop.eup %1329  ;;  %v709_v17 = vadd.f32 1.0, %v1328_v13  ;;  %v625_v60 = vmul.f32 %v1593_v16, %v1643_v1  ;;  %vm817_vm8 = vcmp.gt.f32.partialorder %v1647_v4, 20.0  ;;  %vm818_vm9 = vcmp.gt.f32.partialorder %v1657_v12, 20.0 }
 0x118   : > { %v1332_v20 = vpop.eup %1331  ;;  %v717_v21 = vmul.f32 %v701_v14, %v701_v14  ;;  %v699_v22 = vadd.f32 1.0, %v1330_v15  ;;  %vm825_vm10 = vcmp.gt.f32.partialorder %v1650_v5, 20.0  ;;  %vm826_vm11 = vcmp.gt.f32.partialorder %v1670_v56, 20.0 }
 0x119   : > { %v1334_v24 = vpop.eup %1333  ;;  %v725_v25 = vmul.f32 %v709_v17, %v709_v17  ;;  %v707_v26 = vadd.f32 1.0, %v1332_v20  ;;  %vm815_vm12 = vcmp.gt.f32.partialorder %v1661_v27, 20.0  ;;  %vm823_vm14 = vcmp.gt.f32.partialorder %v1666_v46, 20.0 }
 0x11a   : > { %v1336_v31 = vpop.eup %1335  ;;  %v765_v32 = vadd.f32 1.0, %v717_v21  ;;  %v715_v33 = vmul.f32 %v699_v22, %v699_v22  ;;  %v702_v36 = vadd.f32 1.0, %v1334_v24  ;;  %v1089_v9 = vadd.f32 -1.0, %v717_v21 }
 0x11b   : > { %v1338_v38 = vpop.eup %1337  ;;  %v773_v39 = vadd.f32 1.0, %v725_v25  ;;  %v723_v40 = vmul.f32 %v707_v26, %v707_v26  ;;  %v710_v41 = vadd.f32 1.0, %v1336_v31  ;;  %v1097_v13 = vadd.f32 -1.0, %v725_v25 }
 0x11c   : > { %v1340_v42 = vpop.eup %1339  ;;  %v763_v43 = vadd.f32 1.0, %v715_v33  ;;  %1345 = vrcp.f32 %v765_v32  ;;  %v718_v51 = vmul.f32 %v702_v36, %v702_v36  ;;  %v700_v54 = vadd.f32 1.0, %v1338_v38 }
 0x11d   : > { %v771_v47 = vadd.f32 1.0, %v723_v40  ;;  %1347 = vrcp.f32 %v773_v39  ;;  %v726_v52 = vmul.f32 %v710_v41, %v710_v41  ;;  %v708_v55 = vadd.f32 1.0, %v1340_v42 }
 0x11e   : > { %1349 = vrcp.f32 %v763_v43  ;;  %v1342_v57 = vpop.eup %1341  ;;  %v766_v58 = vadd.f32 1.0, %v718_v51  ;;  %v716_v61 = vmul.f32 %v700_v54, %v700_v54  ;;  %v1087_v14 = vadd.f32 -1.0, %v715_v33 }
 0x11f   : > { %1351 = vrcp.f32 %v771_v47  ;;  %v774_v59 = vadd.f32 1.0, %v726_v52  ;;  %v724_v63 = vmul.f32 %v708_v55, %v708_v55  ;;  %v705_v0 = vadd.f32 1.0, %v1342_v57  ;;  %v1344_v8 = vpop.eup %1343 }
 0x120   : > { %1353 = vpow2.f32 %v681_v50  ;;  %v764_v2 = vadd.f32 1.0, %v716_v61  ;;  %v1095_v15 = vadd.f32 -1.0, %v723_v40  ;;  %v1090_v19 = vadd.f32 -1.0, %v718_v51 }
 0x121   : > { %1355 = vrcp.f32 %v766_v58  ;;  %v772_v6 = vadd.f32 1.0, %v724_v63  ;;  %v1674_v10 = vmul.f32 %v705_v0, %v705_v0  ;;  %v1098_v20 = vadd.f32 -1.0, %v726_v52 }
 0x122   : > { %1357 = vrcp.f32 %v774_v59  ;;  %v697_v22 = vmul.f32 1.442695, %v666_v3  ;;  %v1088_v23 = vadd.f32 -1.0, %v716_v61  ;;  %v713_v24 = vadd.f32 1.0, %v1344_v8 }
 0x123   : > { %1359 = vrcp.f32 %v764_v2  ;;  %v749_v25 = vmul.f32 %v1089_v9, %v1605_v28  ;;  %v1096_v30 = vadd.f32 -1.0, %v724_v63  ;;  %v769_v31 = vadd.f32 1.0, %v1674_v10 }
 0x124   : > { %1361 = vrcp.f32 %v772_v6  ;;  %v617_v32 = vmul.f32 %v1593_v16, %v1640_v62  ;;  %v757_v36 = vmul.f32 %v1097_v13, %v1608_v29  ;;  %v747_v37 = vmul.f32 %v1087_v14, %v1613_v34 }
 0x125   : > { %1363 = vpow2.f32 %v675_v7  ;;  %v755_v38 = vmul.f32 %v1095_v15, %v1616_v35  ;;  %v750_v41 = vmul.f32 %v1090_v19, %v1625_v44  ;;  %v758_v42 = vmul.f32 %v1098_v20, %v1628_v45 }
 0x126   : > { %v1346_v17 = vpop.eup %1345  ;;  %1365 = vpow2.f32 %v691_v11  ;;  %v748_v47 = vmul.f32 %v1088_v23, %v1631_v48  ;;  %v1697_v50 = vmul.f32 %v713_v24, %v713_v24  ;;  %v756_v54 = vmul.f32 %v1096_v30, %v1634_v49 }
 0x127   : > { %v1348_v21 = vpop.eup %1347  ;;  %v797_v40 = vmul.f32 %v1346_v17, %v749_v25  ;;  %1367 = vpow2.f32 %v697_v22  ;;  %v1701_v55 = vadd.f32 %v1598_v18, %v617_v32  ;;  %v1729_v15 = vadd.f32 %v1598_v18, %v625_v60 }
 0x128   : > { %v1350_v26 = vpop.eup %1349  ;;  %v805_v43 = vmul.f32 %v1348_v21, %v757_v36  ;;  %1369 = vrcp.f32 %v769_v31  ;;  %v1093_v23 = vadd.f32 -1.0, %v1674_v10 }
 0x129   : > { %v1352_v33 = vpop.eup %1351  ;;  %v795_v57 = vmul.f32 %v1350_v26, %v747_v37  ;;  %v829_v63 = vsel %vm813_vm0, %v1605_v28, %v797_v40  ;;  %v656_v3 = vmin.f32 %v1701_v55, 20.0  ;;  %vm816_vm13 = vcmp.gt.f32.partialorder %v1701_v55, 20.0 }
 0x12a   : > { %v1354_v39 = vpop.eup %1353  ;;  %v803_v0 = vmul.f32 %v1352_v33, %v755_v38  ;;  %v837_v7 = vsel %vm821_vm1, %v1608_v29, %v805_v43  ;;  %v753_v32 = vmul.f32 %v1093_v23, %v1647_v4  ;;  %vm824_vm15 = vcmp.gt.f32.partialorder %v1729_v15, 20.0 }
 0x12b   : > { %v1356_v62 = vpop.eup %1355  ;;  %v706_v51 = vadd.f32 1.0, %v1354_v39  ;;  %v677_v13 = vmul.f32 1.442695, %v656_v3 }
 0x12c   : > { %v1358_v52 = vpop.eup %1357  ;;  %v798_v53 = vmul.f32 %v1356_v62, %v750_v41 }
 0x12d   : > { %v806_v58 = vmul.f32 %v1358_v52, %v758_v42  ;;  %v722_v59 = vmul.f32 %v706_v51, %v706_v51  ;;  %v1360_v61 = vpop.eup %1359  ;;  %v1101_v42 = vadd.f32 -1.0, %v1697_v50 }
 0x12e   : > { %v830_v2 = vsel %vm814_vm2, %v1625_v44, %v798_v53  ;;  %v1362_v6 = vpop.eup %1361  ;;  %v796_v1 = vmul.f32 %v1360_v61, %v748_v47  ;;  %v827_v44 = vsel %vm811_vm4, %v1613_v34, %v795_v57  ;;  %v835_v34 = vsel %vm819_vm6, %v1616_v35, %v803_v0 }
 0x12f   : > { %v1149_v8 = vpack.c.bf16 %v830_v2, %v829_v63  ;;  %v838_v16 = vsel %vm822_vm3, %v1628_v45, %v806_v58  ;;  %v804_v28 = vmul.f32 %v1362_v6, %v756_v54  ;;  %v770_v11 = vadd.f32 1.0, %v722_v59  ;;  %v1364_v14 = vpop.eup %1363 }
 0x130   : > { %v1169_v9 = vpack.c.bf16 %v838_v16, %v837_v7  ;;  %v828_v29 = vsel %vm812_vm5, %v1631_v48, %v796_v1  ;;  %v777_v45 = vadd.f32 1.0, %v1697_v50  ;;  %v1366_v20 = vpop.eup %1365  ;;  %v664_v48 = vmin.f32 %v1729_v15, 20.0 }
 0x131   : > { %1181 = vst [vmem:[%s1721_s14 + $0x8] sm:$0xff] %v1149_v8   ;;  %v1144_v17 = vpack.c.bf16 %v828_v29, %v827_v44  ;;  %v836_v19 = vsel %vm820_vm7, %v1634_v49, %v804_v28  ;;  %1371 = vrcp.f32 %v770_v11  ;;  %v1368_v21 = vpop.eup %1367  ;;  %v703_v18 = vadd.f32 1.0, %v1364_v14 }
 0x132   : > { %1185 = vst [vmem:[%s1721_s14 + $0x28] sm:$0xff] %v1169_v9   ;;  %v1164_v22 = vpack.c.bf16 %v836_v19, %v835_v34  ;;  %1373 = vpow2.f32 %v677_v13  ;;  %v714_v24 = vadd.f32 1.0, %v1368_v21  ;;  %v693_v35 = vmul.f32 1.442695, %v664_v48  ;;  %v1370_v26 = vpop.eup %1369 }
 0x133   : > { %1145 = vst [vmem:[%s1721_s14] sm:$0xff] %v1144_v17   ;;  %1375 = vrcp.f32 %v777_v45  ;;  %v711_v25 = vadd.f32 1.0, %v1366_v20  ;;  %v1094_v30 = vadd.f32 -1.0, %v722_v59  ;;  %v719_v49 = vmul.f32 %v703_v18, %v703_v18 }
 0x134   : > { %1184 = vst [vmem:[%s1721_s14 + $0x20] sm:$0xff] %v1164_v22   ;;  %v730_v31 = vmul.f32 %v714_v24, %v714_v24  ;;  %1377 = vpow2.f32 %v693_v35  ;;  %v801_v36 = vmul.f32 %v1370_v26, %v753_v32  ;;  %v761_v59 = vmul.f32 %v1101_v42, %v1650_v5 }
 0x135   : > { %v727_v37 = vmul.f32 %v711_v25, %v711_v25  ;;  %v754_v38 = vmul.f32 %v1094_v30, %v1657_v12  ;;  %v767_v40 = vadd.f32 1.0, %v719_v49  ;;  %v1091_v3 = vadd.f32 -1.0, %v719_v49 }
 0x136   : > { %v778_v33 = vadd.f32 1.0, %v730_v31  ;;  %v833_v43 = vsel %vm817_vm8, %v1647_v4, %v801_v36  ;;  %v1102_v54 = vadd.f32 -1.0, %v730_v31 }
 0x137   : > { %v775_v47 = vadd.f32 1.0, %v727_v37  ;;  %v751_v9 = vmul.f32 %v1091_v3, %v1661_v27  ;;  %v1099_v28 = vadd.f32 -1.0, %v727_v37 }
 0x138   : > { %1379 = vrcp.f32 %v778_v33  ;;  %v762_v63 = vmul.f32 %v1102_v54, %v1670_v56 }
 0x139   : > { %1381 = vrcp.f32 %v767_v40 }
 0x13a   : > { %1383 = vrcp.f32 %v775_v47 }
 0x13b   : > { %v1372_v39 = vpop.eup %1371 }
 0x13c   : > { %v1374_v10 = vpop.eup %1373  ;;  %v802_v41 = vmul.f32 %v1372_v39, %v754_v38 }
 0x13d   : > { %v704_v62 = vadd.f32 1.0, %v1374_v10  ;;  %v1376_v52 = vpop.eup %1375 }
 0x13e   : > { %v834_v51 = vsel %vm818_vm9, %v1657_v12, %v802_v41  ;;  %v1378_v58 = vpop.eup %1377  ;;  %v809_v50 = vmul.f32 %v1376_v52, %v761_v59 }
 0x13f   : > { %v1159_v53 = vpack.c.bf16 %v834_v51, %v833_v43  ;;  %v720_v57 = vmul.f32 %v704_v62, %v704_v62  ;;  %v712_v61 = vadd.f32 1.0, %v1378_v58 }
 0x140   : > { %v841_v6 = vsel %vm825_vm10, %v1650_v5, %v809_v50  ;;  %v759_v5 = vmul.f32 %v1099_v28, %v1666_v46 }
 0x141   : > { %1183 = vst [vmem:[%s1721_s14 + $0x18] sm:$0xff] %v1159_v53   ;;  %v768_v60 = vadd.f32 1.0, %v720_v57  ;;  %v728_v4 = vmul.f32 %v712_v61, %v712_v61  ;;  %v1092_v16 = vadd.f32 -1.0, %v720_v57 }
 0x142   : > { %v1380_v0 = vpop.eup %1379 }
 0x143   : > { %1385 = vrcp.f32 %v768_v60  ;;  %v810_v12 = vmul.f32 %v1380_v0, %v762_v63  ;;  %v776_v2 = vadd.f32 1.0, %v728_v4  ;;  %v1382_v1 = vpop.eup %1381  ;;  %v752_v14 = vmul.f32 %v1092_v16, %v1701_v55 }
 0x144   : > { %v1384_v11 = vpop.eup %1383  ;;  %v799_v13 = vmul.f32 %v1382_v1, %v751_v9  ;;  %v1100_v44 = vadd.f32 -1.0, %v728_v4 }
 0x145   : > { %v842_v7 = vsel %vm826_vm11, %v1670_v56, %v810_v12  ;;  %1387 = vrcp.f32 %v776_v2  ;;  %v807_v34 = vmul.f32 %v1384_v11, %v759_v5 }
 0x146   : > { %v1179_v8 = vpack.c.bf16 %v842_v7, %v841_v6  ;;  %v831_v45 = vsel %vm815_vm12, %v1661_v27, %v799_v13  ;;  %v760_v19 = vmul.f32 %v1100_v44, %v1729_v15 }
 0x147   : > { %v839_v27 = vsel %vm823_vm14, %v1666_v46, %v807_v34 }
 0x148   : > { %1187 = vst [vmem:[%s1721_s14 + $0x38] sm:$0xff] %v1179_v8  }
 0x14d   : > { %v1386_v29 = vpop.eup %1385 }
 0x14e   : > { %v800_v56 = vmul.f32 %v1386_v29, %v752_v14 }
 0x14f   : > { %v1388_v20 = vpop.eup %1387 }
 0x150   : > { %v832_v17 = vsel %vm816_vm13, %v1701_v55, %v800_v56  ;;  %v808_v48 = vmul.f32 %v1388_v20, %v760_v19 }
 0x151   : > { %v1154_v22 = vpack.c.bf16 %v832_v17, %v831_v45 }
 0x152   : > { %v840_v21 = vsel %vm824_vm15, %v1729_v15, %v808_v48 }
 0x153   : > { %1182 = vst [vmem:[%s1721_s14 + $0x10] sm:$0xff] %v1154_v22   ;;  %v1174_v55 = vpack.c.bf16 %v840_v21, %v839_v27 }
 0x155   : > { %1186 = vst [vmem:[%s1721_s14 + $0x30] sm:$0xff] %v1174_v55  }
 0x156   : > { %1402 = shalt.err (!%p1399_p5)
}
 0x157   : > { %s1403_s8 = scalar_lea.hbm %s1775_s29, 1024  ;;  %s1407_s11 = scalar_lea.hbm %s1832_s4, 2048 }
 0x158   : > { %p1404_p6 = scmp.ne.s32.totalorder %s1775_s29, %s1403_s8  ;;  %p1408_p10 = scmp.lt.u32.totalorder %s1775_s29, %s1832_s4 }
 0x159   : > { %p1409_p11 = scmp.lt.u32.totalorder %s1407_s11, %s1403_s8  ;;  %p1411_p13 = scmp.lt.u32.totalorder %s1403_s8, %s1775_s29 }
 0x15a   : > { %p1405_p7 = pnand %p1404_p6, %p1537_p4 }
 0x15b   : > { %p1410_p12 = por %p1409_p11, %p1408_p10 }
 0x15c   : > { %p1406_p9 = pneg %p1405_p7 }
 0x15d   : > { %p1412_p0 = por %p1411_p13, %p1410_p12 }
 0x15f   : > { %p1413_p1 = pnand %p1412_p0, %p1406_p9 }
 0x161   : > { %1416 = shalt.err (!%p1413_p1)
}
 0x162   : > { %s1470_s14 = smov 64   ;;  %s1471_s21 = smov 4  }
 0x163   : > { %1252 = dma.vmem_to_hbm [thread:$0]  (%p1537_p4), %s1777_s22, 1024, %s1775_s29, %s1782_s18, %s1470_s14, %s1470_s14, %s1471_s21  }
 0x164 PF: > { %p1258_p2 = scmp.ge.s32.totalorder %s1467_s20, 2  ;;  %s953_s24 = sand.u32 1, %s1447_s15  }
 0x165   : > { %s954_s26 = scalar_lea.sflag [#allocation4], %s953_s24 }
 0x166   : > { %p1255_p3 = pnand %p1258_p2, %p1544_p8 }
 0x168   : > { %1442 = dma.done.wait (!%p1255_p3), %s954_s26, 1024  }
 0x169   : > { %1444 = vsyncadd (!%p1255_p3), %s954_s26, 4294966272  ;;  %s17_s20 = sadd.s32 1, %s1467_s20   ;;  %s1835_s15 = smov %s1451_s16 }
 0x16a   : > { %p14_p5 = scmp.ge.s32.totalorder %s17_s20, 4   ;;  %s1836_s16 = smov %s1455_s17 }
 0x16b   : > { %s1837_s17 = smov %s1550_s28  ;;  %s1838_s18 = smov %s1463_s19 }
 0x16c   : > { %s1839_s19 = smov %s1841_s23  ;;  %16 = sbr.rel (!%p14_p5) target bundleno = 4 (0x4), region = 88 }
 0x173   :  { %959 = vsyncpa [#allocation4], 1 }
 0x174   :  { %961 = vsyncpa [#allocation4 + $0x1], 1 }

</bundles_post_ra>
